<compile_context>
chip_gen: v7x
topology: tpu7x:2x2x1
jax: 0.10.0
libtpu: 0.0.40
codegen_flags: <defaults>
</compile_context>

<pallas_src>
import functools

import jax
import jax.numpy as jnp
from jax.experimental import pallas as pl
from jax.experimental.pallas import tpu as pltpu


def _round_up(x: int, m: int) -> int:
    return ((x + m - 1) // m) * m


def _mlp_kernel(x_ref, w1_ref, b1_ref, w2_ref, b2_ref, w3_ref, b3_ref, o_ref,
                *, matmul_dtype):
    # x: (TILE_B, F)   w1: (F, Hp)  b1: (1, Hp)
    # w2: (Hp, Hp)     b2: (1, Hp)
    # w3: (Hp, Op)     b3: (1, Op)  out: (TILE_B, Op)
    x = x_ref[...]

    h1 = jnp.dot(x, w1_ref[...], preferred_element_type=jnp.float32)
    h1 = jnp.maximum(h1 + b1_ref[...], 0.0)                      # ReLU (f32)

    h2 = jnp.dot(h1.astype(matmul_dtype), w2_ref[...],
                 preferred_element_type=jnp.float32)
    h2 = jnp.maximum(h2 + b2_ref[...], 0.0)                      # ReLU (f32)

    h3 = jnp.dot(h2.astype(matmul_dtype), w3_ref[...],
                 preferred_element_type=jnp.float32)
    h3 = h3 + b3_ref[...]

    o_ref[...] = jax.nn.sigmoid(h3).astype(o_ref.dtype)          # Sigmoid


@functools.partial(jax.jit, static_argnames=("tile_b", "cast_matmul_to_bf16"))
def mlp_forward(x, w1, b1, w2, b2, w3, b3, *, tile_b=512,
                cast_matmul_to_bf16=False):
    """Fused MLP forward.  x: (B, F) f32.  Weights (in, out), biases (1, out)."""
    B, F = x.shape
    H = w1.shape[1]
    O = w3.shape[1]

    # ---- lane-pad hidden and output dims to 128 (compute-internal only) ----
    H_pad = _round_up(H, 128)
    O_pad = _round_up(O, 128)

    w1p = jnp.pad(w1, ((0, 0), (0, H_pad - H)))
    b1p = jnp.pad(b1, ((0, 0), (0, H_pad - H)))
    w2p = jnp.pad(w2, ((0, H_pad - H), (0, H_pad - H)))
    b2p = jnp.pad(b2, ((0, 0), (0, H_pad - H)))
    w3p = jnp.pad(w3, ((0, H_pad - H), (0, O_pad - O)))
    b3p = jnp.pad(b3, ((0, 0), (0, O_pad - O)))

    # ---- batch tiling (sublane-aligned, ragged batch padded with zeros) ----
    matmul_dtype = jnp.bfloat16 if cast_matmul_to_bf16 else jnp.float32
    sublane = 16 if cast_matmul_to_bf16 else 8
    tb = max(sublane, min(tile_b, _round_up(B, sublane)))
    tb = _round_up(tb, sublane)
    B_pad = _round_up(B, tb)
    xp = jnp.pad(x, ((0, B_pad - B), (0, 0)))

    if cast_matmul_to_bf16:
        xp = xp.astype(jnp.bfloat16)
        w1p = w1p.astype(jnp.bfloat16)
        w2p = w2p.astype(jnp.bfloat16)
        w3p = w3p.astype(jnp.bfloat16)

    grid = (B_pad // tb,)

    # Advisory cost hint for the surrounding XLA schedule.
    flops = 2 * B_pad * (F * H_pad + H_pad * H_pad + H_pad * O_pad)
    bytes_accessed = (
        xp.size * xp.dtype.itemsize
        + B_pad * O_pad * 4
        + sum(a.size * a.dtype.itemsize for a in (w1p, b1p, w2p, b2p, w3p, b3p))
    )
    cost = pl.CostEstimate(flops=flops,
                           transcendentals=B_pad * O_pad,
                           bytes_accessed=bytes_accessed)

    resident = lambda shape: pl.BlockSpec(shape, lambda i: (0, 0))

    out_padded = pl.pallas_call(
        functools.partial(_mlp_kernel, matmul_dtype=matmul_dtype),
        out_shape=jax.ShapeDtypeStruct((B_pad, O_pad), jnp.float32),
        grid_spec=pltpu.PrefetchScalarGridSpec(
            num_scalar_prefetch=0,
            grid=grid,
            in_specs=[
                pl.BlockSpec((tb, F), lambda i: (i, 0)),       # x tile
                resident((F, H_pad)), resident((1, H_pad)),    # w1, b1
                resident((H_pad, H_pad)), resident((1, H_pad)),  # w2, b2
                resident((H_pad, O_pad)), resident((1, O_pad)),  # w3, b3
            ],
            out_specs=pl.BlockSpec((tb, O_pad), lambda i: (i, 0)),
        ),
        compiler_params=pltpu.CompilerParams(
            dimension_semantics=("parallel",)),
        cost_estimate=cost,
    )(xp, w1p, b1p, w2p, b2p, w3p, b3p)

    # Drop padded batch rows and padded output lanes (padding cols = 0.5).
    return out_padded[:B, :O]


def init_mlp_params(key, feature_count, hidden, output_size):
    """Deterministic init mimicking torch.nn.Linear (uniform +-1/sqrt(fan_in)).

    Weights stored as (in_features, out_features) so the kernel uses x @ W.
    Biases stored as (1, out_features) for broadcast inside the kernel.
    """
    keys = jax.random.split(key, 6)

    def linear(kw, kb, fan_in, fan_out):
        bound = 1.0 / jnp.sqrt(fan_in)
        w = jax.random.uniform(kw, (fan_in, fan_out), jnp.float32, -bound, bound)
        b = jax.random.uniform(kb, (1, fan_out), jnp.float32, -bound, bound)
        return w, b

    w1, b1 = linear(keys[0], keys[1], feature_count, hidden)
    w2, b2 = linear(keys[2], keys[3], hidden, hidden)
    w3, b3 = linear(keys[4], keys[5], hidden, output_size)
    return w1, b1, w2, b2, w3, b3


def reference_forward(x, w1, b1, w2, b2, w3, b3):
    h = jnp.maximum(x @ w1 + b1, 0.0)
    h = jnp.maximum(h @ w2 + b2, 0.0)
    return jax.nn.sigmoid(h @ w3 + b3)


if __name__ == "__main__":
    feature_count = 16
    hidden = 32
    output_size = 8
    batch = 8

    key = jax.random.PRNGKey(0)
    k_x, k_p, k_big = jax.random.split(key, 3)

    x = jax.random.normal(k_x, (batch, feature_count), jnp.float32)
    params = init_mlp_params(k_p, feature_count, hidden, output_size)

    # --- small-batch f32 path (tight tolerance vs f32 reference) ---
    out = jax.block_until_ready(mlp_forward(x, *params))
    ref = reference_forward(x, *params)
    assert out.shape == (batch, output_size)
    assert jnp.allclose(out, ref, atol=1e-5, rtol=1e-5), "f32 mismatch vs reference"

    # --- ragged larger batch exercising the tiled grid (grid > 1) ---
    x_big = jax.random.normal(k_big, (1000, feature_count), jnp.float32)
    out_big = jax.block_until_ready(mlp_forward(x_big, *params))
    ref_big = reference_forward(x_big, *params)
    assert out_big.shape == (1000, output_size)
    assert jnp.allclose(out_big, ref_big, atol=1e-5, rtol=1e-5), "tiled f32 mismatch"

    # --- bf16 matmul-operand path (v6e/v7x HBM-traffic optimization) ---
    out_bf16 = jax.block_until_ready(
        mlp_forward(x_big, *params, cast_matmul_to_bf16=True))
    assert jnp.allclose(out_bf16, ref_big, atol=3e-2, rtol=3e-2), "bf16 mismatch"

    print("KERNEL_OK")
</pallas_src>

<mosaic_0001>
module attributes {stable_mosaic.version = 11 : i64} {
  func.func @_mlp_kernel(%arg0: i32, %arg1: memref<8x16xf32, #tpu.memory_space<vmem>>, %arg2: memref<16x128xf32, #tpu.memory_space<vmem>>, %arg3: memref<1x128xf32, #tpu.memory_space<vmem>>, %arg4: memref<128x128xf32, #tpu.memory_space<vmem>>, %arg5: memref<1x128xf32, #tpu.memory_space<vmem>>, %arg6: memref<128x128xf32, #tpu.memory_space<vmem>>, %arg7: memref<1x128xf32, #tpu.memory_space<vmem>>, %arg8: memref<8x128xf32, #tpu.memory_space<vmem>>) attributes {dimension_semantics = [#tpu.dimension_semantics<parallel>], iteration_bounds = array<i64: 1>, scalar_prefetch = 0 : i64, scratch_operands = 0 : i64, tpu.core_type = #tpu.core_type<tc>, window_params = [{transform_indices = @transform_0, window_bounds = array<i64: 8, 16>}, {pipeline_mode = #tpu.pipeline_mode<synchronous>, transform_indices = @transform_1, window_bounds = array<i64: 16, 128>}, {pipeline_mode = #tpu.pipeline_mode<synchronous>, transform_indices = @transform_2, window_bounds = array<i64: 1, 128>}, {pipeline_mode = #tpu.pipeline_mode<synchronous>, transform_indices = @transform_3, window_bounds = array<i64: 128, 128>}, {pipeline_mode = #tpu.pipeline_mode<synchronous>, transform_indices = @transform_4, window_bounds = array<i64: 1, 128>}, {pipeline_mode = #tpu.pipeline_mode<synchronous>, transform_indices = @transform_5, window_bounds = array<i64: 128, 128>}, {pipeline_mode = #tpu.pipeline_mode<synchronous>, transform_indices = @transform_6, window_bounds = array<i64: 1, 128>}, {transform_indices = @transform_7, window_bounds = array<i64: 8, 128>}]} {
    %c0 = arith.constant 0 : index
    %c0_0 = arith.constant 0 : index
    %0 = vector.load %arg1[%c0, %c0_0] : memref<8x16xf32, #tpu.memory_space<vmem>>, vector<8x16xf32>
    %c0_1 = arith.constant 0 : index
    %c0_2 = arith.constant 0 : index
    %1 = vector.load %arg2[%c0_1, %c0_2] : memref<16x128xf32, #tpu.memory_space<vmem>>, vector<16x128xf32>
    %cst = arith.constant dense<0.000000e+00> : vector<8x128xf32>
    %2 = tpu.matmul %0, %1, %cst {dimension_numbers = #tpu.dot_dimension_numbers<[1], [0], [0], [1], [0, 0, 1, 1], [], []>} : vector<8x16xf32>, vector<16x128xf32>, vector<8x128xf32> -> vector<8x128xf32>
    %c0_3 = arith.constant 0 : index
    %c0_4 = arith.constant 0 : index
    %3 = vector.load %arg3[%c0_3, %c0_4] : memref<1x128xf32, #tpu.memory_space<vmem>>, vector<1x128xf32>
    %4 = vector.broadcast %3 : vector<1x128xf32> to vector<8x128xf32>
    %5 = arith.addf %2, %4 : vector<8x128xf32>
    %cst_5 = arith.constant 0.000000e+00 : f32
    %6 = vector.broadcast %cst_5 : f32 to vector<8x128xf32>
    %7 = arith.maximumf %5, %6 : vector<8x128xf32>
    %c0_6 = arith.constant 0 : index
    %c0_7 = arith.constant 0 : index
    %8 = vector.load %arg4[%c0_6, %c0_7] : memref<128x128xf32, #tpu.memory_space<vmem>>, vector<128x128xf32>
    %cst_8 = arith.constant dense<0.000000e+00> : vector<8x128xf32>
    %9 = tpu.matmul %7, %8, %cst_8 {dimension_numbers = #tpu.dot_dimension_numbers<[1], [0], [0], [1], [0, 0, 1, 1], [], []>} : vector<8x128xf32>, vector<128x128xf32>, vector<8x128xf32> -> vector<8x128xf32>
    %c0_9 = arith.constant 0 : index
    %c0_10 = arith.constant 0 : index
    %10 = vector.load %arg5[%c0_9, %c0_10] : memref<1x128xf32, #tpu.memory_space<vmem>>, vector<1x128xf32>
    %11 = vector.broadcast %10 : vector<1x128xf32> to vector<8x128xf32>
    %12 = arith.addf %9, %11 : vector<8x128xf32>
    %cst_11 = arith.constant 0.000000e+00 : f32
    %13 = vector.broadcast %cst_11 : f32 to vector<8x128xf32>
    %14 = arith.maximumf %12, %13 : vector<8x128xf32>
    %c0_12 = arith.constant 0 : index
    %c0_13 = arith.constant 0 : index
    %15 = vector.load %arg6[%c0_12, %c0_13] : memref<128x128xf32, #tpu.memory_space<vmem>>, vector<128x128xf32>
    %cst_14 = arith.constant dense<0.000000e+00> : vector<8x128xf32>
    %16 = tpu.matmul %14, %15, %cst_14 {dimension_numbers = #tpu.dot_dimension_numbers<[1], [0], [0], [1], [0, 0, 1, 1], [], []>} : vector<8x128xf32>, vector<128x128xf32>, vector<8x128xf32> -> vector<8x128xf32>
    %c0_15 = arith.constant 0 : index
    %c0_16 = arith.constant 0 : index
    %17 = vector.load %arg7[%c0_15, %c0_16] : memref<1x128xf32, #tpu.memory_space<vmem>>, vector<1x128xf32>
    %18 = vector.broadcast %17 : vector<1x128xf32> to vector<8x128xf32>
    %19 = arith.addf %16, %18 : vector<8x128xf32>
    %20 = arith.negf %19 : vector<8x128xf32>
    %21 = math.exp %20 : vector<8x128xf32>
    %cst_17 = arith.constant 1.000000e+00 : f32
    %22 = vector.broadcast %cst_17 : f32 to vector<8x128xf32>
    %23 = arith.addf %22, %21 : vector<8x128xf32>
    %24 = arith.divf %22, %23 : vector<8x128xf32>
    %c0_18 = arith.constant 0 : index
    %c0_19 = arith.constant 0 : index
    %25 = vector.load %arg8[%c0_18, %c0_19] : memref<8x128xf32, #tpu.memory_space<vmem>>, vector<8x128xf32>
    tpu.vector_store %arg8[%c0_18, %c0_19], %24 {strides = array<i32>} : memref<8x128xf32, #tpu.memory_space<vmem>>, vector<8x128xf32>,
    return
  }
  func.func @transform_0(%arg0: i32) -> (i32, i32) {
    %c0_i32 = arith.constant 0 : i32
    %c0_i32_0 = arith.constant 0 : i32
    return %arg0, %c0_i32 : i32, i32
  }
  func.func @transform_1(%arg0: i32) -> (i32, i32) {
    %c0_i32 = arith.constant 0 : i32
    %c0_i32_0 = arith.constant 0 : i32
    %c0_i32_1 = arith.constant 0 : i32
    return %c0_i32, %c0_i32_0 : i32, i32
  }
  func.func @transform_2(%arg0: i32) -> (i32, i32) {
    %c0_i32 = arith.constant 0 : i32
    %c0_i32_0 = arith.constant 0 : i32
    %c0_i32_1 = arith.constant 0 : i32
    return %c0_i32, %c0_i32_0 : i32, i32
  }
  func.func @transform_3(%arg0: i32) -> (i32, i32) {
    %c0_i32 = arith.constant 0 : i32
    %c0_i32_0 = arith.constant 0 : i32
    %c0_i32_1 = arith.constant 0 : i32
    return %c0_i32, %c0_i32_0 : i32, i32
  }
  func.func @transform_4(%arg0: i32) -> (i32, i32) {
    %c0_i32 = arith.constant 0 : i32
    %c0_i32_0 = arith.constant 0 : i32
    %c0_i32_1 = arith.constant 0 : i32
    return %c0_i32, %c0_i32_0 : i32, i32
  }
  func.func @transform_5(%arg0: i32) -> (i32, i32) {
    %c0_i32 = arith.constant 0 : i32
    %c0_i32_0 = arith.constant 0 : i32
    %c0_i32_1 = arith.constant 0 : i32
    return %c0_i32, %c0_i32_0 : i32, i32
  }
  func.func @transform_6(%arg0: i32) -> (i32, i32) {
    %c0_i32 = arith.constant 0 : i32
    %c0_i32_0 = arith.constant 0 : i32
    %c0_i32_1 = arith.constant 0 : i32
    return %c0_i32, %c0_i32_0 : i32, i32
  }
  func.func @transform_7(%arg0: i32) -> (i32, i32) {
    %c0_i32 = arith.constant 0 : i32
    %c0_i32_0 = arith.constant 0 : i32
    return %arg0, %c0_i32 : i32, i32
  }
}

</mosaic_0001>

<bundles_post_ra>
// kernel: mlp_forward.1
= control target key start
LH: loop header
LB: loop body
LE: loop exit
PB: predicated region body
PF: predicated region fallthrough
CT: control target
= control target key end

     0   :  { %v522_v2 = vmov 0.0|0.0   ;;  %vm523_vm0 = vmmov 0   ;;  %v524_v4 = vmov 0.0   ;;  %vm37_vm1 = vcmask 130048   ;;  %s712_s0 = inlined_call_operand.vmem [shape: f32[8,16], index: 0, kind: input, shape index: {}]   ;;  %s713_s1 = inlined_call_operand.vmem [shape: f32[16,128], index: 1, kind: input, shape index: {}]   ;;  %s714_s2 = inlined_call_operand.vmem [shape: f32[1,128], index: 2, kind: input, shape index: {}]   ;;  %s715_s3 = inlined_call_operand.vmem [shape: f32[128,128], index: 3, kind: input, shape index: {}]   ;;  %s716_s4 = inlined_call_operand.vmem [shape: f32[1,128], index: 4, kind: input, shape index: {}]   ;;  %s717_s5 = inlined_call_operand.vmem [shape: f32[128,128], index: 5, kind: input, shape index: {}]   ;;  %s718_s6 = inlined_call_operand.vmem [shape: f32[1,128], index: 6, kind: input, shape index: {}]   ;;  %s719_s7 = inlined_call_operand.hbm [shape: f32[8,128], index: 7, kind: output, shape index: {}]  }
   0x1   :  { %v28_v0 = vld [vmem:[%s713_s1] sm:$0xff]  ;;  %v29_v1 = vld [vmem:[%s713_s1 + $0x8] sm:$0xff]  ;;  %439 = vmatprep.subr.bf16.mxu0 %v522_v2  ;;  %366 = vmatprep.mubr.msk.f32.mxu0 %vm523_vm0, %v524_v4  ;;  %v114_v7 = vld [vmem:[%s715_s3 + $0x10] sm:$0xff] }
   0x2   :  { %v440_v3 = vpack.c.bf16 %v29_v1, %v28_v0  ;;  %v112_v5 = vld [vmem:[%s715_s3] sm:$0xff]  ;;  %v113_v6 = vld [vmem:[%s715_s3 + $0x8] sm:$0xff]  ;;  %442 = vmatprep.subr.bf16.mxu1 %v522_v2  ;;  %v115_v9 = vld [vmem:[%s715_s3 + $0x18] sm:$0xff]  ;;  %401 = vmatprep.mubr.msk.f32.mxu1 %vm523_vm0, %v524_v4 }
   0x3   :  { %v443_v8 = vpack.c.bf16 %v113_v6, %v112_v5  ;;  %v27_v10 = vld [vmem:[%s712_s0] sm:$0xff]  ;;  %v446_v11 = vpack.c.bf16 %v115_v9, %v114_v7  ;;  %v117_v13 = vld [vmem:[%s715_s3 + $0x28] sm:$0xff] }
   0x4   :  { %441 = vmatpush3.bf16.msra.mxu0 %v440_v3  ;;  %v116_v12 = vld [vmem:[%s715_s3 + $0x20] sm:$0xff] }
   0x5   :  { %444 = vmatpush3.bf16.msra.mxu1 %v443_v8  ;;  %466 = vmatprep.subr.bf16.mxu0 %v522_v2 }
   0x6   :  { %445 = vmatprep.subr.bf16.mxu1 %v522_v2 }
   0x7   :  { %367 = vmatmul.mubr.msk.f32.vlgmr.msra.gmra.mrb[0].mxu0 %vm37_vm1, %v27_v10 }
   0x8   :  { %12 = vsyncpa [#allocation3], 0  ;;  %436 = vmatprep.mubr.msk.f32.mxu0 %vm523_vm0, %v524_v4  ;;  %v449_v14 = vpack.c.bf16 %v117_v13, %v116_v12  ;;  %v118_v15 = vld [vmem:[%s715_s3 + $0x30] sm:$0xff]  ;;  %v119_v16 = vld [vmem:[%s715_s3 + $0x38] sm:$0xff] }
   0x9   :  { %447 = vmatpush3.bf16.msra.mxu1 %v446_v11  ;;  %v452_v17 = vpack.c.bf16 %v119_v16, %v118_v15  ;;  %v120_v18 = vld [vmem:[%s715_s3 + $0x40] sm:$0xff]  ;;  %v121_v19 = vld [vmem:[%s715_s3 + $0x48] sm:$0xff]  ;;  %v122_v21 = vld [vmem:[%s715_s3 + $0x50] sm:$0xff] }
   0xa   :  { %448 = vmatprep.subr.bf16.mxu1 %v522_v2  ;;  %v455_v20 = vpack.c.bf16 %v121_v19, %v120_v18  ;;  %v123_v22 = vld [vmem:[%s715_s3 + $0x58] sm:$0xff]  ;;  %v124_v24 = vld [vmem:[%s715_s3 + $0x60] sm:$0xff]  ;;  %v125_v25 = vld [vmem:[%s715_s3 + $0x68] sm:$0xff] }
   0xb   :  { %v458_v23 = vpack.c.bf16 %v123_v22, %v122_v21  ;;  %v461_v26 = vpack.c.bf16 %v125_v25, %v124_v24  ;;  %v126_v27 = vld [vmem:[%s715_s3 + $0x70] sm:$0xff]  ;;  %v127_v28 = vld [vmem:[%s715_s3 + $0x78] sm:$0xff]  ;;  %v206_v30 = vld [vmem:[%s717_s5] sm:$0xff] }
   0xc   :  { %v464_v29 = vpack.c.bf16 %v127_v28, %v126_v27  ;;  %v207_v31 = vld [vmem:[%s717_s5 + $0x8] sm:$0xff]  ;;  %v208_v32 = vld [vmem:[%s717_s5 + $0x10] sm:$0xff]  ;;  %v209_v34 = vld [vmem:[%s717_s5 + $0x18] sm:$0xff] }
   0xd   :  { %450 = vmatpush3.bf16.msra.mxu1 %v449_v14  ;;  %v467_v33 = vpack.c.bf16 %v207_v31, %v206_v30  ;;  %v470_v35 = vpack.c.bf16 %v209_v34, %v208_v32  ;;  %v210_v36 = vld [vmem:[%s717_s5 + $0x20] sm:$0xff]  ;;  %v211_v37 = vld [vmem:[%s717_s5 + $0x28] sm:$0xff]  ;;  %v212_v39 = vld [vmem:[%s717_s5 + $0x30] sm:$0xff] }
   0xe   :  { %451 = vmatprep.subr.bf16.mxu1 %v522_v2  ;;  %v473_v38 = vpack.c.bf16 %v211_v37, %v210_v36  ;;  %v213_v40 = vld [vmem:[%s717_s5 + $0x38] sm:$0xff]  ;;  %v214_v42 = vld [vmem:[%s717_s5 + $0x40] sm:$0xff]  ;;  %v215_v43 = vld [vmem:[%s717_s5 + $0x48] sm:$0xff] }
   0xf   :  { %468 = vmatpush3.bf16.msra.mxu0 %v467_v33  ;;  %v476_v41 = vpack.c.bf16 %v213_v40, %v212_v39  ;;  %v479_v44 = vpack.c.bf16 %v215_v43, %v214_v42  ;;  %v216_v45 = vld [vmem:[%s717_s5 + $0x50] sm:$0xff]  ;;  %v217_v46 = vld [vmem:[%s717_s5 + $0x58] sm:$0xff]  ;;  %v218_v48 = vld [vmem:[%s717_s5 + $0x60] sm:$0xff] }
  0x10   :  { %469 = vmatprep.subr.bf16.mxu0 %v522_v2  ;;  %v482_v47 = vpack.c.bf16 %v217_v46, %v216_v45  ;;  %v219_v49 = vld [vmem:[%s717_s5 + $0x68] sm:$0xff]  ;;  %v320_v51 = vld [vmem:[%s714_s2] ss:$0 sm:$0xff]  ;;  %v220_v56 = vld [vmem:[%s717_s5 + $0x70] sm:$0xff] }
  0x11   :  { %453 = vmatpush3.bf16.msra.mxu1 %v452_v17  ;;  %v485_v50 = vpack.c.bf16 %v219_v49, %v218_v48  ;;  %v221_v57 = vld [vmem:[%s717_s5 + $0x78] sm:$0xff]  ;;  %v322_v59 = vld [vmem:[%s716_s4] ss:$0 sm:$0xff]  ;;  %s525_s5 = smov [#allocation2]  }
  0x12   :  { %454 = vmatprep.subr.bf16.mxu1 %v522_v2  ;;  %v488_v58 = vpack.c.bf16 %v221_v57, %v220_v56  ;;  %v323_v0 = vld [vmem:[%s718_s6] ss:$0 sm:$0xff]  ;;  %s312_s22 = sshll.u32 %s525_s5, 4  ;;  %s313_s22 = int_to_ptr.vmem [resolvable:$true] %s312_s22 }
  0x13   :  { %471 = vmatpush3.bf16.msra.mxu0 %v470_v35  ;;  %s498_s4 = scalar_lea.vmem %s313_s22, 128  ;;  %p503_p1 = scmp.lt.s32.totalorder %s313_s22, %s313_s22 }
  0x14   :  { %472 = vmatprep.subr.bf16.mxu0 %v522_v2  ;;  %p499_p0 = scmp.ne.s32.totalorder %s313_s22, %s498_s4  ;;  %p504_p2 = scmp.lt.s32.totalorder %s498_s4, %s498_s4 }
  0x15   :  { %456 = vmatpush3.bf16.msra.mxu1 %v455_v20 }
  0x16   :  { %457 = vmatprep.subr.bf16.mxu1 %v522_v2  ;;  %p505_p3 = por %p504_p2, %p503_p1 }
  0x17   :  { %474 = vmatpush3.bf16.msra.mxu0 %v473_v38 }
  0x18   :  { %475 = vmatprep.subr.bf16.mxu0 %v522_v2  ;;  %p506_p4 = pnand %p505_p3, %p499_p0 }
  0x19   :  { %459 = vmatpush3.bf16.msra.mxu1 %v458_v23 }
  0x1a   :  { %460 = vmatprep.subr.bf16.mxu1 %v522_v2 }
  0x1b   :  { %477 = vmatpush3.bf16.msra.mxu0 %v476_v41 }
  0x1c   :  { %478 = vmatprep.subr.bf16.mxu0 %v522_v2 }
  0x1d   :  { %462 = vmatpush3.bf16.msra.mxu1 %v461_v26 }
  0x1e   :  { %463 = vmatprep.subr.bf16.mxu1 %v522_v2 }
  0x1f   :  { %480 = vmatpush3.bf16.msra.mxu0 %v479_v44 }
  0x20   :  { %481 = vmatprep.subr.bf16.mxu0 %v522_v2 }
  0x21   :  { %465 = vmatpush3.bf16.msra.mxu1 %v464_v29 }
  0x23   :  { %483 = vmatpush3.bf16.msra.mxu0 %v482_v47 }
  0x24   :  { %484 = vmatprep.subr.bf16.mxu0 %v522_v2 }
  0x27   :  { %486 = vmatpush3.bf16.msra.mxu0 %v485_v50 }
  0x28   :  { %487 = vmatprep.subr.bf16.mxu0 %v522_v2 }
  0x2b   :  { %489 = vmatpush3.bf16.msra.mxu0 %v488_v58 }
  0xda   :  { %v107_v52 = vpop.f32.mrb[0].mxu0 }
  0xdb   :  { %v108_v53 = vadd.f32 %v320_v51, %v107_v52  ;;  %v368_v54 = vpop.f32.mrb[1].mxu0 }
  0xdd   :  { %v111_v55 = vmax.f32 %v108_v53, 0.0 }
  0xdf   :  { %402 = vmatmul.mubr.f32.vlgmr.msra.gmra.mrb[0].mxu1 %v111_v55 }
 0x1b2   :  { %v201_v60 = vpop.f32.mrb[0].mxu1 }
 0x1b3   :  { %v202_v61 = vadd.f32 %v322_v59, %v201_v60  ;;  %v403_v62 = vpop.f32.mrb[1].mxu1 }
 0x1b5   :  { %v205_v63 = vmax.f32 %v202_v61, 0.0 }
 0x1b7   :  { %437 = vmatmul.mubr.f32.vlgmr.msra.gmra.mrb[2].mxu0 %v205_v63 }
 0x28a   :  { %v295_v1 = vpop.f32.mrb[2].mxu0 }
 0x28b   :  { %v296_v2 = vadd.f32 %v323_v0, %v295_v1  ;;  %v438_v3 = vpop.f32.mrb[3].mxu0 }
 0x28d   :  { %v324_v4 = vmul.f32 -1.442695, %v296_v2 }
 0x28f   :  { %494 = vpow2.f32 %v324_v4 }
 0x299   :  { %v495_v5 = vpop.eup %494 }
 0x29a   :  { %v302_v6 = vadd.f32 1.0, %v495_v5 }
 0x29c   :  { %496 = vrcp.f32 %v302_v6 }
 0x2a6   :  { %v497_v7 = vpop.eup %496 }
 0x2a7   :  { %305 = vst [vmem:[#allocation2] sm:$0xff] %v497_v7 }
 0x2a8   :  { %509 = shalt.err (!%p506_p4)
}
 0x2a9   :  { %s510_s24 = scalar_lea.hbm %s719_s7, 128 }
 0x2aa   :  { %p511_p5 = scmp.ne.s32.totalorder %s719_s7, %s510_s24  ;;  %p514_p6 = scmp.lt.u32.totalorder %s510_s24, %s719_s7 }
 0x2ac   :  { %p516_p7 = pnand %p514_p6, %p511_p5 }
 0x2ae   :  { %519 = shalt.err (!%p516_p7)
}
 0x2af   :  { %315 = dma.vmem_to_hbm [thread:$0]  %s313_s22, 128, %s719_s7, [#allocation3]  }
 0x2b0   :  { %520 = dma.done.wait [#allocation3], 128  }
 0x2b1   :  { %521 = vsyncadd [#allocation3], 4294967168 }
 0x2b2   :  { %319 = vsyncpa [#allocation3], 1 }

</bundles_post_ra>
